<compile_context>
chip_gen: v7x
topology: tpu7x:2x2x1
jax: 0.10.0
libtpu: 0.0.40
codegen_flags: <defaults>
</compile_context>

<pallas_src>
import jax
import jax.numpy as jnp
from jax.experimental import pallas as pl
from jax.experimental.pallas import tpu as pltpu


def _round_up(x, m):
    return ((x + m - 1) // m) * m


def bp_fnn_forward(data, para_mu, para_sigma, para_w3, *, batch_tile=None):
    data = jnp.asarray(data, jnp.float32)
    para_mu = jnp.asarray(para_mu, jnp.float32)
    para_sigma = jnp.asarray(para_sigma, jnp.float32)
    para_w3 = jnp.asarray(para_w3, jnp.float32)

    B, F = data.shape
    R = para_mu.shape[0]

    Fk = _round_up(F, 8)          # feature axis, sublane aligned (NOT 128)
    Rp = _round_up(R, 8)          # rule axis, sublane aligned
    Kc = 2 * Fk + 8               # [x*x | x | bias-ones] contraction width

    # --- batch tiling: lanes=128, >=2 grid steps when possible, <=2048 rows --
    if batch_tile is None:
        b128 = _round_up(B, 128)
        if b128 <= 128:
            tb = 128
        else:
            tb = min(2048, _round_up(pl.cdiv(b128, 2), 128))
    else:
        tb = _round_up(batch_tile, 128)
    Bp = _round_up(B, tb)
    grid = Bp // tb

    # --- precompute the single fused parameter matrix once, outside kernel ---
    #   -(x-mu)^2/(2 s^2) = (-1/(2 s^2))*x^2 + (mu/s^2)*x - mu^2/(2 s^2)
    inv_2s2 = 1.0 / (2.0 * para_sigma * para_sigma)             # (R, F)
    quad_coef = -inv_2s2                                        # x^2 coefficients
    lin_coef = para_mu / (para_sigma * para_sigma)              # x coefficients
    # TODO(synk): c can overflow f32 for extremely small sigma (torch runs this
    # in f64); acceptable for the uniform-[0,1) parameters used here.
    c_col = -jnp.sum(para_mu * para_mu * inv_2s2, axis=1)       # (R,)

    bigm = jnp.zeros((2 * Rp, Kc), jnp.float32)
    bigm = bigm.at[:R, :F].set(quad_coef)                       # exponent: x^2 part
    bigm = bigm.at[:R, Fk:Fk + F].set(lin_coef)                 # exponent: x part
    bigm = bigm.at[:R, 2 * Fk].set(c_col)                       # exponent: constant
    bigm = bigm.at[R:Rp, 2 * Fk].set(-1e30)                     # padded rules -> exp()==0
    bigm = bigm.at[Rp:Rp + R, Fk:Fk + F].set(para_w3[:, 1:])    # consequent weights
    bigm = bigm.at[Rp:Rp + R, 2 * Fk].set(para_w3[:, 0])        # consequent bias

    # Data transposed so the batch rides the lane axis; pad features to Fk and
    # batch to Bp.  Padded feature rows hit all-zero parameter columns, padded
    # batch lanes are sliced off below.
    data_t = jnp.zeros((Fk, Bp), jnp.float32).at[:F, :B].set(data.T)

    def kernel(x_ref, bigm_ref, out_ref):
        xt = x_ref[...]                                          # (Fk, tb)
        ones = jnp.ones((8, tb), jnp.float32)                    # bias-constant rows
        lhs = jnp.concatenate([xt * xt, xt, ones], axis=0)       # (Kc, tb)
        big = jnp.dot(bigm_ref[...], lhs,
                      preferred_element_type=jnp.float32)        # (2Rp, tb)
        expo = big[:Rp]                                          # Gaussian exponent^T
        conq = big[Rp:]                                          # TSK consequent^T
        # layer_rule = prod_f exp(.) == exp(sum_f .), plus torch's
        # `10 ^ -18` (XOR) bug == -28, applied only to real rule rows.
        rule_id = jax.lax.broadcasted_iota(jnp.int32, (Rp, 1), 0)
        rule = jnp.exp(expo) + jnp.where(rule_id < R, -28.0, 0.0)
        # Fused normalization: sigmoid( sum_r rule*conq / sum_r rule ).
        num = jnp.sum(rule * conq, axis=0, keepdims=True)        # (1, tb)
        den = jnp.sum(rule, axis=0, keepdims=True)               # (1, tb)
        res = jax.nn.sigmoid(num * pl.reciprocal(den, approx=True))
        out_ref[...] = res.reshape(1, 1, tb)                     # lane-dense store
        # TODO(synk): the torch module conditionally prints a warning when NaNs
        # appear; data-dependent host printing has no Pallas equivalent.

    # Right-sized VMEM budget: double-buffered data/out tiles + resident params
    # + live (Rp, tb)/(Kc, tb) intermediates, plus slack; clamp to [8, 32] MiB.
    vmem_bytes = 4 * (2 * Fk * tb + 2 * tb + 2 * Rp * Kc
                      + 6 * Rp * tb + 2 * Kc * tb) + (2 << 20)
    vmem_bytes = int(min(max(vmem_bytes, 8 << 20), 32 << 20))

    out = pl.pallas_call(
        kernel,
        out_shape=jax.ShapeDtypeStruct((grid, 1, tb), jnp.float32),
        grid_spec=pltpu.PrefetchScalarGridSpec(
            num_scalar_prefetch=0,
            grid=(grid,),
            in_specs=[
                pl.BlockSpec((Fk, tb), lambda i: (0, i)),        # data^T tile (streams)
                pl.BlockSpec((2 * Rp, Kc), lambda i: (0, 0)),    # fused params (resident)
            ],
            out_specs=pl.BlockSpec((1, 1, tb), lambda i: (i, 0, 0)),
        ),
        compiler_params=pltpu.CompilerParams(
            dimension_semantics=("parallel",),
            vmem_limit_bytes=vmem_bytes,
        ),
    )(data_t, bigm)
    return out.reshape(Bp)[:B]


def bp_fnn_reference(data, para_mu, para_sigma, para_w3):
    """Pure-JAX reference mirroring the torch forward (in float32)."""
    fuzz = jnp.exp(-(data[:, None, :] - para_mu[None]) ** 2
                   / (2.0 * para_sigma[None] ** 2))
    rule = jnp.prod(fuzz, axis=2) + jnp.float32(-28.0)   # 10 ^ -18 == -28
    inv_frn = 1.0 / jnp.sum(rule, axis=1, keepdims=True)
    norm = rule * inv_frn
    conq = para_w3[:, 0][None, :] + jnp.sum(
        para_w3[None, :, 1:] * data[:, None, :], axis=2)
    return jax.nn.sigmoid(jnp.sum(norm * conq, axis=1))


if __name__ == "__main__":
    n_rules, n_fea, batch = 4, 8, 8

    key = jax.random.PRNGKey(0)
    k_mu, k_sig, k_w3, k_x = jax.random.split(key, 4)

    # torch.rand -> uniform [0, 1)
    para_mu = jax.random.uniform(k_mu, (n_rules, n_fea), dtype=jnp.float32)
    para_sigma = jax.random.uniform(k_sig, (n_rules, n_fea), dtype=jnp.float32)
    para_w3 = jax.random.uniform(k_w3, (n_rules, n_fea + 1), dtype=jnp.float32)

    data = jax.random.uniform(k_x, (batch, n_fea), dtype=jnp.float32)

    out = bp_fnn_forward(data, para_mu, para_sigma, para_w3)
    out = jax.block_until_ready(out)

    ref = bp_fnn_reference(data, para_mu, para_sigma, para_w3)
    assert out.shape == (batch,)
    # The kernel uses the quadratic expansion (MXU form) for the Gaussian
    # exponent and an approximate EUP reciprocal for the normalization; both
    # are algebraically identical to the torch form but can differ from the
    # direct float32 evaluation at the ~1e-4..1e-3 level, hence the tolerance.
    assert jnp.allclose(out, ref, atol=1e-3, rtol=1e-3), (out, ref)

    print("KERNEL_OK")
</pallas_src>

<mosaic_0001>
module attributes {stable_mosaic.version = 11 : i64} {
  func.func @kernel(%arg0: i32, %arg1: memref<8x128xf32, #tpu.memory_space<vmem>>, %arg2: memref<16x24xf32, #tpu.memory_space<vmem>>, %arg3: memref<1x1x128xf32, #tpu.memory_space<vmem>>) attributes {dimension_semantics = [#tpu.dimension_semantics<parallel>], iteration_bounds = array<i64: 1>, scalar_prefetch = 0 : i64, scratch_operands = 0 : i64, tpu.core_type = #tpu.core_type<tc>, window_params = [{transform_indices = @transform_0, window_bounds = array<i64: 8, 128>}, {pipeline_mode = #tpu.pipeline_mode<synchronous>, transform_indices = @transform_1, window_bounds = array<i64: 16, 24>}, {transform_indices = @transform_2, window_bounds = array<i64: 1, 1, 128>}]} {
    %c0 = arith.constant 0 : index
    %c0_0 = arith.constant 0 : index
    %0 = vector.load %arg1[%c0, %c0_0] : memref<8x128xf32, #tpu.memory_space<vmem>>, vector<8x128xf32>
    %cst = arith.constant 1.000000e+00 : f32
    %1 = vector.broadcast %cst : f32 to vector<8x128xf32>
    %2 = arith.mulf %0, %0 : vector<8x128xf32>
    %3 = tpu.concatenate %2, %0, %1 in 0 : vector<8x128xf32>, vector<8x128xf32>, vector<8x128xf32> -> vector<24x128xf32>
    %c0_1 = arith.constant 0 : index
    %c0_2 = arith.constant 0 : index
    %4 = vector.load %arg2[%c0_1, %c0_2] : memref<16x24xf32, #tpu.memory_space<vmem>>, vector<16x24xf32>
    %cst_3 = arith.constant dense<0.000000e+00> : vector<16x128xf32>
    %5 = tpu.matmul %4, %3, %cst_3 {dimension_numbers = #tpu.dot_dimension_numbers<[1], [0], [0], [1], [0, 0, 1, 1], [], []>} : vector<16x24xf32>, vector<24x128xf32>, vector<16x128xf32> -> vector<16x128xf32>
    %6 = vector.extract_strided_slice %5 {offsets = [0, 0], sizes = [8, 128], strides = [1, 1]} : vector<16x128xf32> to vector<8x128xf32>
    %7 = vector.extract_strided_slice %5 {offsets = [8, 0], sizes = [8, 128], strides = [1, 1]} : vector<16x128xf32> to vector<8x128xf32>
    %8 = tpu.iota {dimensions = array<i32: 0>} : vector<8x1xi32>
    %9 = math.exp %6 : vector<8x128xf32>
    %c4_i32 = arith.constant 4 : i32
    %10 = vector.broadcast %c4_i32 : i32 to vector<8x1xi32>
    %11 = arith.cmpi slt, %8, %10 : vector<8x1xi32>
    %cst_4 = arith.constant -2.800000e+01 : f32
    %cst_5 = arith.constant 0.000000e+00 : f32
    %12 = vector.broadcast %cst_4 : f32 to vector<8x1xf32>
    %13 = vector.broadcast %cst_5 : f32 to vector<8x1xf32>
    %14 = arith.select %11, %12, %13 : vector<8x1xi1>, vector<8x1xf32>
    %15 = vector.broadcast %14 : vector<8x1xf32> to vector<8x128xf32>
    %16 = arith.addf %9, %15 : vector<8x128xf32>
    %17 = arith.mulf %16, %7 : vector<8x128xf32>
    %cst_6 = arith.constant dense<0.000000e+00> : vector<128xf32>
    %18 = vector.multi_reduction <add>, %17, %cst_6 [0] : vector<8x128xf32> to vector<128xf32>
    %19 = vector.shape_cast %18 : vector<128xf32> to vector<1x128xf32>
    %cst_7 = arith.constant dense<0.000000e+00> : vector<128xf32>
    %20 = vector.multi_reduction <add>, %16, %cst_7 [0] : vector<8x128xf32> to vector<128xf32>
    %21 = vector.shape_cast %20 : vector<128xf32> to vector<1x128xf32>
    %22 = tpu.reciprocal %21 {approx = true} : vector<1x128xf32> -> vector<1x128xf32>
    %23 = arith.mulf %19, %22 : vector<1x128xf32>
    %24 = arith.negf %23 : vector<1x128xf32>
    %25 = math.exp %24 : vector<1x128xf32>
    %cst_8 = arith.constant 1.000000e+00 : f32
    %26 = vector.broadcast %cst_8 : f32 to vector<1x128xf32>
    %27 = arith.addf %26, %25 : vector<1x128xf32>
    %28 = arith.divf %26, %27 : vector<1x128xf32>
    %29 = vector.shape_cast %28 : vector<1x128xf32> to vector<1x1x128xf32>
    %c0_9 = arith.constant 0 : index
    %c0_10 = arith.constant 0 : index
    %c0_11 = arith.constant 0 : index
    %30 = vector.load %arg3[%c0_9, %c0_10, %c0_11] : memref<1x1x128xf32, #tpu.memory_space<vmem>>, vector<1x1x128xf32>
    tpu.vector_store %arg3[%c0_9, %c0_10, %c0_11], %29 {strides = array<i32>} : memref<1x1x128xf32, #tpu.memory_space<vmem>>, vector<1x1x128xf32>,
    return
  }
  func.func @transform_0(%arg0: i32) -> (i32, i32) {
    %c0_i32 = arith.constant 0 : i32
    %c0_i32_0 = arith.constant 0 : i32
    return %c0_i32, %arg0 : i32, i32
  }
  func.func @transform_1(%arg0: i32) -> (i32, i32) {
    %c0_i32 = arith.constant 0 : i32
    %c0_i32_0 = arith.constant 0 : i32
    %c0_i32_1 = arith.constant 0 : i32
    return %c0_i32, %c0_i32_0 : i32, i32
  }
  func.func @transform_2(%arg0: i32) -> (i32, i32, i32) {
    %c0_i32 = arith.constant 0 : i32
    %c0_i32_0 = arith.constant 0 : i32
    %c0_i32_1 = arith.constant 0 : i32
    return %arg0, %c0_i32, %c0_i32_0 : i32, i32, i32
  }
}

</mosaic_0001>

<bundles_post_ra>
// kernel: tpu_custom_call.1
= control target key start
LH: loop header
LB: loop body
LE: loop exit
PB: predicated region body
PF: predicated region fallthrough
CT: control target
= control target key end

     0   :  { %7 = vsyncpa [#allocation3], 0  ;;  %s342_s0 = inlined_call_operand.hbm [shape: f32[8,128], index: 0, kind: input, shape index: {}]   ;;  %s343_s1 = inlined_call_operand.hbm [shape: f32[16,24], index: 1, kind: input, shape index: {}]   ;;  %s344_s2 = inlined_call_operand.hbm [shape: f32[1,1,128], index: 2, kind: output, shape index: {}]  }
   0x1   :  { %8 = vsyncpa [#allocation6], 0 }
   0x2   :  { %9 = vsyncpa [#allocation4], 0  ;;  %s277_s9 = smov [#allocation2]   ;;  %s278_s11 = smov [#allocation5]  }
   0x3   :  { %s16_s10 = sshll.u32 %s277_s9, 4  ;;  %s25_s12 = sshll.u32 %s278_s11, 4  ;;  %s17_s10 = int_to_ptr.vmem [resolvable:$true] %s16_s10  ;;  %s299_s12 = int_to_ptr.vmem [resolvable:$true] %s25_s12 }
   0x4   :  { %s205_s15 = scalar_lea.hbm %s342_s0, 128 }
   0x5   :  { %p206_p0 = scmp.ne.s32.totalorder %s342_s0, %s205_s15  ;;  %p209_p1 = scmp.lt.u32.totalorder %s205_s15, %s342_s0 }
   0x7   :  { %p211_p2 = pnand %p209_p1, %p206_p0 }
   0x9   :  { %214 = shalt.err (!%p211_p2)
}
   0xa   :  { %s215_s20 = scalar_lea.vmem %s17_s10, 128  ;;  %p220_p4 = scmp.lt.s32.totalorder %s17_s10, %s17_s10 }
   0xb   :  { %p216_p3 = scmp.ne.s32.totalorder %s17_s10, %s215_s20  ;;  %p221_p5 = scmp.lt.s32.totalorder %s215_s20, %s215_s20 }
   0xd   :  { %p222_p6 = por %p221_p5, %p220_p4 }
   0xf   :  { %p223_p7 = pnand %p222_p6, %p216_p3 }
  0x11   :  { %226 = shalt.err (!%p223_p7)
}
  0x12   :  { %19 = dma.hbm_to_vmem [thread:$0]  %s342_s0, 128, %s17_s10, [#allocation3]  }
  0x13   :  { %s227_s25 = scalar_lea.hbm %s343_s1, 256 }
  0x14   :  { %p228_p8 = scmp.ne.s32.totalorder %s343_s1, %s227_s25  ;;  %p231_p9 = scmp.lt.u32.totalorder %s227_s25, %s343_s1 }
  0x16   :  { %p233_p10 = pnand %p231_p9, %p228_p8 }
  0x18   :  { %236 = shalt.err (!%p233_p10)
}
  0x19   :  { %s237_s30 = scalar_lea.vmem %s299_s12, 256  ;;  %p242_p12 = scmp.lt.s32.totalorder %s299_s12, %s299_s12 }
  0x1a   :  { %p238_p11 = scmp.ne.s32.totalorder %s299_s12, %s237_s30  ;;  %p243_p13 = scmp.lt.s32.totalorder %s237_s30, %s237_s30 }
  0x1c   :  { %p244_p0 = por %p243_p13, %p242_p12 }
  0x1e   :  { %p245_p1 = pnand %p244_p0, %p238_p11 }
  0x20   :  { %248 = shalt.err (!%p245_p1)
}
  0x21   :  { %s279_s0 = smov 128   ;;  %s280_s3 = smov 8  }
  0x22   :  { %31 = dma.hbm_to_vmem [thread:$0]  %s343_s1, 256, %s299_s12, [#allocation6], %s279_s0, %s279_s0, %s280_s3  }
  0x23   :  { %271 = dma.done.wait [#allocation3], 128  }
  0x24   :  { %272 = vsyncadd [#allocation3], 4294967168 }
  0x25   :  { %273 = dma.done.wait [#allocation6], 256  }
  0x26   :  { %274 = vsyncadd [#allocation6], 4294967040  ;;  %vm42_vm0 = vcmask 195584   ;;  %v38_v0 = vld [vmem:[#allocation2] sm:$0xff]  ;;  %v40_v1 = vld [vmem:[#allocation5] sm:$0xff]  ;;  %v281_v4 = vmov 1.0   ;;  %v124_v8 = vlaneseq }
  0x27   :  { %v39_v2 = vmul.f32 %v38_v0, %v38_v0  ;;  %183 = vmatprep.mubr.msk.f32.mxu0 %vm42_vm0, %v40_v1  ;;  %v41_v5 = vld [vmem:[#allocation5 + $0x8] sm:$0xff]  ;;  %v282_v11 = vmov 0.0   ;;  %s283_s1 = smov [#allocation7]  }
  0x28   :  { %v125_v10 = vshrl.u32 %v124_v8, 7  ;;  %s159_s6 = sshll.u32 %s283_s1, 4  ;;  %s160_s6 = int_to_ptr.vmem [resolvable:$true] %s159_s6 }
  0x29   :  { %v186_v3 = vpack.c.bf16 %v38_v0, %v39_v2  ;;  %s249_s7 = scalar_lea.vmem %s160_s6, 16  ;;  %s253_s8 = scalar_lea.vmem %s160_s6, 32 }
  0x2a   :  { %vm128_vm1 = vcmp.lt.s32.totalorder %v125_v10, 4  ;;  %p250_p2 = scmp.ne.s32.totalorder %s160_s6, %s249_s7  ;;  %p254_p3 = scmp.lt.s32.totalorder %s160_s6, %s160_s6 }
  0x2b   :  { %187 = vmatprep.subr.bf16.mxu0 %v186_v3  ;;  %v129_v12 = vsel %vm128_vm1, -28.0, %v282_v11  ;;  %p255_p4 = scmp.lt.s32.totalorder %s253_s8, %s249_s7 }
  0x2c   :  { %189 = vmatpush3.bf16.msra.mxu0 %v186_v3 }
  0x2d   :  { %181 = vmatprep.subr.mxu0 %v281_v4  ;;  %p256_p5 = por %p255_p4, %p254_p3 }
  0x2f   :  { %p257_p6 = pnand %p256_p5, %p250_p2 }
  0x30   :  { %182 = vmatpush3.msra.mxu0 %v281_v4 }
  0x31   :  { %184 = vmatmul.mubr.msk.f32.vlgmr.msra.gmra.mrb[0].mxu0 %vm42_vm0, %v41_v5 }
 0x104   :  { %v185_v6 = vpop.f32.mrb[0].mxu0 }
 0x105   :  { %v115_v7 = vpop.f32.mrb[1].mxu0 }
 0x106   :  { %v126_v9 = vmul.f32 1.442695, %v115_v7 }
 0x108   :  { %197 = vpow2.f32 %v126_v9 }
 0x112   :  { %v198_v13 = vpop.eup %197 }
 0x113   :  { %v130_v14 = vadd.f32 %v198_v13, %v129_v12 }
 0x115   :  { %v131_v15 = vmul.f32 %v185_v6, %v130_v14  ;;  %v138_v16 = vrot.slane %v130_v14, 4 }
 0x117   :  { %v132_v17 = vrot.slane %v131_v15, 4  ;;  %v139_v18 = vadd.f32 %v138_v16, %v130_v14 }
 0x119   :  { %v140_v19 = vrot.slane %v139_v18, 2  ;;  %v133_v20 = vadd.f32 %v132_v17, %v131_v15 }
 0x11b   :  { %v141_v21 = vadd.f32 %v140_v19, %v139_v18  ;;  %v134_v23 = vrot.slane %v133_v20, 2 }
 0x11d   :  { %v142_v22 = vrot.slane %v141_v21, 1  ;;  %v135_v25 = vadd.f32 %v134_v23, %v133_v20 }
 0x11f   :  { %v143_v24 = vadd.f32 %v142_v22, %v141_v21  ;;  %v136_v26 = vrot.slane %v135_v25, 1 }
 0x121   :  { %199 = vrcp.f32 %v143_v24  ;;  %v137_v27 = vadd.f32 %v136_v26, %v135_v25 }
 0x12b   :  { %v200_v28 = vpop.eup %199 }
 0x12c   :  { %v145_v29 = vmul.f32 %v200_v28, %v137_v27 }
 0x12e   :  { %v171_v30 = vmul.f32 -1.442695, %v145_v29 }
 0x130   :  { %201 = vpow2.f32 %v171_v30 }
 0x13a   :  { %v202_v31 = vpop.eup %201 }
 0x13b   :  { %v149_v32 = vadd.f32 1.0, %v202_v31 }
 0x13d   :  { %203 = vrcp.f32 %v149_v32 }
 0x147   :  { %v204_v33 = vpop.eup %203 }
 0x148   :  { %152 = vst [vmem:[#allocation7] sm:$0x1] %v204_v33 }
 0x149   :  { %260 = shalt.err (!%p257_p6)
}
 0x14a   :  { %s261_s11 = scalar_lea.hbm %s344_s2, 16 }
 0x14b   :  { %p262_p7 = scmp.ne.s32.totalorder %s344_s2, %s261_s11  ;;  %p265_p8 = scmp.lt.u32.totalorder %s261_s11, %s344_s2 }
 0x14d   :  { %p267_p9 = pnand %p265_p8, %p262_p7 }
 0x14f   :  { %270 = shalt.err (!%p267_p9)
}
 0x150   :  { %162 = dma.vmem_to_hbm [thread:$0]  %s160_s6, 16, %s344_s2, [#allocation4]  }
 0x151   :  { %275 = dma.done.wait [#allocation4], 16  }
 0x152   :  { %276 = vsyncadd [#allocation4], 4294967280 }
 0x153   :  { %166 = vsyncpa [#allocation3], 1 }
 0x154   :  { %167 = vsyncpa [#allocation6], 1 }
 0x155   :  { %168 = vsyncpa [#allocation4], 1 }

</bundles_post_ra>
